<compile_context>
chip_gen: v6e
topology: v6e:2x2x1
jax: 0.10.0
libtpu: 0.0.40
codegen_flags: <defaults>
</compile_context>

<pallas_src>
import jax
import jax.numpy as jnp
from jax.experimental import pallas as pl
from jax.experimental.pallas import tpu as pltpu


def _round_up(x, m):
    return ((x + m - 1) // m) * m


def _classifier_head(img_feat, w_cls_img_ref, feat_ref, w_cls_feat_ref, out_ref):
    """sigmoid(img_feat @ Wc_img + feat @ Wc_feat + b), as VPU mul + lane reduce."""
    logits = jnp.sum(img_feat * w_cls_img_ref[...], axis=1, keepdims=True)
    logits = logits + jnp.sum(feat_ref[...] * w_cls_feat_ref[...], axis=1, keepdims=True)
    out_ref[...] = (1.0 / (1.0 + jnp.exp(-logits))).astype(out_ref.dtype)


def _clip_kernel_single(
    img_ref,         # [tb, d_pad]   bf16  flattened images (batch on sublanes)
    w_proj_ref,      # [d_pad, P_pad] bf16 synthetic visual projection
    w_cls_img_ref,   # [1, P_pad]    f32   classifier rows acting on image features
    feat_ref,        # [tb, F1_pad]  f32   extra features + constant-1 bias column
    w_cls_feat_ref,  # [1, F1_pad]   f32   classifier rows acting on features + bias
    out_ref,         # [tb, 1]       f32   sigmoid probabilities
):
    # Whole reduction in one step: MXU matmul, bf16 operands, f32 accumulate.
    img_feat = jnp.dot(img_ref[...], w_proj_ref[...], preferred_element_type=jnp.float32)
    _classifier_head(img_feat, w_cls_img_ref, feat_ref, w_cls_feat_ref, out_ref)


def _clip_kernel_ktiled(
    img_ref,         # [tb, tk]      bf16
    w_proj_ref,      # [tk, P_pad]   bf16
    w_cls_img_ref,   # [1, P_pad]    f32
    feat_ref,        # [tb, F1_pad]  f32
    w_cls_feat_ref,  # [1, F1_pad]   f32
    out_ref,         # [tb, 1]       f32
    acc_ref,         # [tb, P_pad]   f32   VMEM accumulator (image features)
):
    k = pl.program_id(1)

    @pl.when(k == 0)
    def _():
        acc_ref[...] = jnp.zeros_like(acc_ref)

    acc_ref[...] += jnp.dot(
        img_ref[...], w_proj_ref[...], preferred_element_type=jnp.float32
    )

    @pl.when(k == pl.num_programs(1) - 1)
    def _():
        _classifier_head(acc_ref[...], w_cls_img_ref, feat_ref, w_cls_feat_ref, out_ref)


def clip_classifier_forward(images, features, w_proj, w_cls, b_cls):
    """images: [B, C, H, W] f32, features: [B, F] f32,
    w_proj: [C*H*W, P] (synthetic get_image_features), w_cls: [P+F, 1], b_cls: [1]."""
    B = images.shape[0]
    d_in = images.shape[1] * images.shape[2] * images.shape[3]
    P = w_proj.shape[1]
    F = features.shape[1]
    F1 = F + 1  # + constant-1 bias column

    # ---- tiling ----------------------------------------------------------
    # Batch on sublanes (bf16 sublane packing -> multiple of 16); for large B use
    # 256-wide batch tiles (v6e/v7x MXU-native, gives v7x a parallel axis).
    B_pad = _round_up(B, 16)
    if B_pad <= 256:
        tb = B_pad
    else:
        tb = 256
        B_pad = _round_up(B, tb)
    num_b = B_pad // tb

    # K tile: single grid step for small D_in, tk>=512 otherwise.
    P_pad = _round_up(P, 128)
    F1_pad = _round_up(F1, 128)
    d_aligned = _round_up(d_in, 128)
    if d_aligned <= 2048:
        tk = d_aligned                       # one K step: no scratch, no pl.when
    else:
        tk = 512
    d_pad = _round_up(d_in, tk)
    num_k = d_pad // tk

    # ---- layout plumbing (wrapper-side; zero-padded, bf16 MXU operands) ----
    img_pad = (
        jnp.zeros((B_pad, d_pad), jnp.bfloat16)
        .at[:B, :d_in].set(images.reshape(B, d_in).astype(jnp.bfloat16))
    )
    w_proj_pad = (
        jnp.zeros((d_pad, P_pad), jnp.bfloat16)
        .at[:d_in, :P].set(w_proj.astype(jnp.bfloat16))
    )
    # Lane-dense classifier rows; bias folded in as a constant-1 feature column
    # (only for real batch rows, so padded rows produce exactly-zero logits).
    w_cls_img_row = (
        jnp.zeros((1, P_pad), jnp.float32).at[0, :P].set(w_cls[:P, 0].astype(jnp.float32))
    )
    feat_pad = (
        jnp.zeros((B_pad, F1_pad), jnp.float32)
        .at[:B, :F].set(features.astype(jnp.float32))
        .at[:B, F].set(1.0)
    )
    w_cls_feat_row = (
        jnp.zeros((1, F1_pad), jnp.float32)
        .at[0, :F].set(w_cls[P:, 0].astype(jnp.float32))
        .at[0, F].set(b_cls.reshape(()).astype(jnp.float32))
    )

    # ---- explicit VMEM budget (double-buffered blocks + accumulator) -------
    vmem_bytes = (
        2 * tb * tk * 2          # img block (bf16), 2 buffers
        + 2 * tk * P_pad * 2     # w_proj block (bf16), 2 buffers
        + 2 * 8 * P_pad * 4      # w_cls_img row (sublane-padded tile)
        + 2 * tb * F1_pad * 4    # features block
        + 2 * 8 * F1_pad * 4     # w_cls_feat row
        + 2 * tb * 128 * 4       # output block (lane-padded tile)
        + (tb * P_pad * 4 if num_k > 1 else 0)  # f32 accumulator scratch
    )
    vmem_limit = min(max(2 * vmem_bytes, 16 << 20), 48 << 20)  # keep under v7x's 64 MiB

    out_shape = jax.ShapeDtypeStruct((B_pad, 1), jnp.float32)

    if num_k == 1:
        # Single-step reduction: grid over batch blocks only, no accumulator.
        out = pl.pallas_call(
            _clip_kernel_single,
            out_shape=out_shape,
            grid=(num_b,),
            in_specs=[
                pl.BlockSpec((tb, d_pad), lambda b: (b, 0)),
                pl.BlockSpec((d_pad, P_pad), lambda b: (0, 0)),
                pl.BlockSpec((1, P_pad), lambda b: (0, 0)),
                pl.BlockSpec((tb, F1_pad), lambda b: (b, 0)),
                pl.BlockSpec((1, F1_pad), lambda b: (0, 0)),
            ],
            out_specs=pl.BlockSpec((tb, 1), lambda b: (b, 0)),
            compiler_params=pltpu.CompilerParams(
                dimension_semantics=("parallel",),
                vmem_limit_bytes=vmem_limit,
            ),
        )(img_pad, w_proj_pad, w_cls_img_row, feat_pad, w_cls_feat_row)
    else:
        # K-tiled reduction with a resident f32 accumulator.
        out = pl.pallas_call(
            _clip_kernel_ktiled,
            out_shape=out_shape,
            grid=(num_b, num_k),
            in_specs=[
                pl.BlockSpec((tb, tk), lambda b, k: (b, k)),
                pl.BlockSpec((tk, P_pad), lambda b, k: (k, 0)),
                pl.BlockSpec((1, P_pad), lambda b, k: (0, 0)),
                pl.BlockSpec((tb, F1_pad), lambda b, k: (b, 0)),
                pl.BlockSpec((1, F1_pad), lambda b, k: (0, 0)),
            ],
            out_specs=pl.BlockSpec((tb, 1), lambda b, k: (b, 0)),
            scratch_shapes=[pltpu.VMEM((tb, P_pad), jnp.float32)],
            compiler_params=pltpu.CompilerParams(
                dimension_semantics=("parallel", "arbitrary"),
                vmem_limit_bytes=vmem_limit,
            ),
        )(img_pad, w_proj_pad, w_cls_img_row, feat_pad, w_cls_feat_row)

    # Un-pad: probabilities for the real batch, shaped [B, 1] like the module.
    return out[:B, :]


if __name__ == "__main__":
    # Small shapes consistent with the module's forward:
    #   images:   [B=2, C=3, H=16, W=16]  (NCHW)
    #   features: [B=2, F=9]              (feature_vector_size=9)
    #   visual_projection_dim P = 32  ->  feature_dim = 32 + 9 = 41
    B, C, H, W = 2, 3, 16, 16
    P = 32
    F = 9
    D_IN = C * H * W

    key = jax.random.PRNGKey(0)
    k_img, k_feat, k_proj, k_w, k_b = jax.random.split(key, 5)

    images = jax.random.normal(k_img, (B, C, H, W), dtype=jnp.float32)
    features = jax.random.normal(k_feat, (B, F), dtype=jnp.float32)

    # Deterministic parameter init (synthetic stand-in, not a checkpoint).
    w_proj = 0.02 * jax.random.normal(k_proj, (D_IN, P), dtype=jnp.float32)
    w_cls = 0.1 * jax.random.normal(k_w, (P + F, 1), dtype=jnp.float32)
    b_cls = 0.1 * jax.random.normal(k_b, (1,), dtype=jnp.float32)

    out = clip_classifier_forward(images, features, w_proj, w_cls, b_cls)
    out = jax.block_until_ready(out)

    # Reference with the same dtype policy (bf16 projection operands, f32 accum).
    img_feat_ref = jnp.dot(
        images.reshape(B, D_IN).astype(jnp.bfloat16),
        w_proj.astype(jnp.bfloat16),
        preferred_element_type=jnp.float32,
    )
    combined = jnp.concatenate([img_feat_ref, features.astype(jnp.float32)], axis=1)
    ref = jax.nn.sigmoid(combined @ w_cls + b_cls)

    assert out.shape == (B, 1), out.shape
    assert jnp.allclose(out, ref, atol=5e-4, rtol=5e-4), (out, ref)

    print("KERNEL_OK")
</pallas_src>

<mosaic_0001>
module attributes {stable_mosaic.version = 11 : i64} {
  func.func @_clip_kernel_single(%arg0: i32, %arg1: memref<16x768xbf16, #tpu.memory_space<vmem>>, %arg2: memref<768x128xbf16, #tpu.memory_space<vmem>>, %arg3: memref<1x128xf32, #tpu.memory_space<vmem>>, %arg4: memref<16x128xf32, #tpu.memory_space<vmem>>, %arg5: memref<1x128xf32, #tpu.memory_space<vmem>>, %arg6: memref<16x1xf32, #tpu.memory_space<vmem>>) attributes {dimension_semantics = [#tpu.dimension_semantics<parallel>], iteration_bounds = array<i64: 1>, scalar_prefetch = 0 : i64, scratch_operands = 0 : i64, tpu.core_type = #tpu.core_type<tc>, window_params = [{transform_indices = @transform_0, window_bounds = array<i64: 16, 768>}, {pipeline_mode = #tpu.pipeline_mode<synchronous>, transform_indices = @transform_1, window_bounds = array<i64: 768, 128>}, {pipeline_mode = #tpu.pipeline_mode<synchronous>, transform_indices = @transform_2, window_bounds = array<i64: 1, 128>}, {transform_indices = @transform_3, window_bounds = array<i64: 16, 128>}, {pipeline_mode = #tpu.pipeline_mode<synchronous>, transform_indices = @transform_4, window_bounds = array<i64: 1, 128>}, {transform_indices = @transform_5, window_bounds = array<i64: 16, 1>}]} {
    %c0 = arith.constant 0 : index
    %c0_0 = arith.constant 0 : index
    %0 = vector.load %arg1[%c0, %c0_0] : memref<16x768xbf16, #tpu.memory_space<vmem>>, vector<16x768xbf16>
    %c0_1 = arith.constant 0 : index
    %c0_2 = arith.constant 0 : index
    %1 = vector.load %arg2[%c0_1, %c0_2] : memref<768x128xbf16, #tpu.memory_space<vmem>>, vector<768x128xbf16>
    %cst = arith.constant dense<0.000000e+00> : vector<16x128xf32>
    %2 = tpu.matmul %0, %1, %cst {dimension_numbers = #tpu.dot_dimension_numbers<[1], [0], [0], [1], [0, 0, 1, 1], [], []>} : vector<16x768xbf16>, vector<768x128xbf16>, vector<16x128xf32> -> vector<16x128xf32>
    %c0_3 = arith.constant 0 : index
    %c0_4 = arith.constant 0 : index
    %3 = vector.load %arg3[%c0_3, %c0_4] : memref<1x128xf32, #tpu.memory_space<vmem>>, vector<1x128xf32>
    %4 = vector.broadcast %3 : vector<1x128xf32> to vector<16x128xf32>
    %5 = arith.mulf %2, %4 : vector<16x128xf32>
    %cst_5 = arith.constant dense<0.000000e+00> : vector<16xf32>
    %6 = vector.multi_reduction <add>, %5, %cst_5 [1] : vector<16x128xf32> to vector<16xf32>
    %7 = vector.shape_cast %6 : vector<16xf32> to vector<16x1xf32>
    %c0_6 = arith.constant 0 : index
    %c0_7 = arith.constant 0 : index
    %8 = vector.load %arg4[%c0_6, %c0_7] : memref<16x128xf32, #tpu.memory_space<vmem>>, vector<16x128xf32>
    %c0_8 = arith.constant 0 : index
    %c0_9 = arith.constant 0 : index
    %9 = vector.load %arg5[%c0_8, %c0_9] : memref<1x128xf32, #tpu.memory_space<vmem>>, vector<1x128xf32>
    %10 = vector.broadcast %9 : vector<1x128xf32> to vector<16x128xf32>
    %11 = arith.mulf %8, %10 : vector<16x128xf32>
    %cst_10 = arith.constant dense<0.000000e+00> : vector<16xf32>
    %12 = vector.multi_reduction <add>, %11, %cst_10 [1] : vector<16x128xf32> to vector<16xf32>
    %13 = vector.shape_cast %12 : vector<16xf32> to vector<16x1xf32>
    %14 = arith.addf %7, %13 : vector<16x1xf32>
    %cst_11 = arith.constant 0.000000e+00 : f32
    %15 = vector.broadcast %cst_11 : f32 to vector<16x1xf32>
    %16 = arith.subf %15, %14 : vector<16x1xf32>
    %17 = math.exp %16 : vector<16x1xf32>
    %cst_12 = arith.constant 1.000000e+00 : f32
    %18 = vector.broadcast %cst_12 : f32 to vector<16x1xf32>
    %19 = arith.addf %18, %17 : vector<16x1xf32>
    %cst_13 = arith.constant 1.000000e+00 : f32
    %20 = vector.broadcast %cst_13 : f32 to vector<16x1xf32>
    %21 = arith.divf %20, %19 : vector<16x1xf32>
    %c0_14 = arith.constant 0 : index
    %c0_15 = arith.constant 0 : index
    %22 = vector.load %arg6[%c0_14, %c0_15] : memref<16x1xf32, #tpu.memory_space<vmem>>, vector<16x1xf32>
    tpu.vector_store %arg6[%c0_14, %c0_15], %21 {strides = array<i32>} : memref<16x1xf32, #tpu.memory_space<vmem>>, vector<16x1xf32>,
    return
  }
  func.func @transform_0(%arg0: i32) -> (i32, i32) {
    %c0_i32 = arith.constant 0 : i32
    %c0_i32_0 = arith.constant 0 : i32
    return %arg0, %c0_i32 : i32, i32
  }
  func.func @transform_1(%arg0: i32) -> (i32, i32) {
    %c0_i32 = arith.constant 0 : i32
    %c0_i32_0 = arith.constant 0 : i32
    %c0_i32_1 = arith.constant 0 : i32
    return %c0_i32, %c0_i32_0 : i32, i32
  }
  func.func @transform_2(%arg0: i32) -> (i32, i32) {
    %c0_i32 = arith.constant 0 : i32
    %c0_i32_0 = arith.constant 0 : i32
    %c0_i32_1 = arith.constant 0 : i32
    return %c0_i32, %c0_i32_0 : i32, i32
  }
  func.func @transform_3(%arg0: i32) -> (i32, i32) {
    %c0_i32 = arith.constant 0 : i32
    %c0_i32_0 = arith.constant 0 : i32
    return %arg0, %c0_i32 : i32, i32
  }
  func.func @transform_4(%arg0: i32) -> (i32, i32) {
    %c0_i32 = arith.constant 0 : i32
    %c0_i32_0 = arith.constant 0 : i32
    %c0_i32_1 = arith.constant 0 : i32
    return %c0_i32, %c0_i32_0 : i32, i32
  }
  func.func @transform_5(%arg0: i32) -> (i32, i32) {
    %c0_i32 = arith.constant 0 : i32
    %c0_i32_0 = arith.constant 0 : i32
    return %arg0, %c0_i32 : i32, i32
  }
}

</mosaic_0001>

<bundles_post_ra>
// kernel: tpu_custom_call.1
= control target key start
LH: loop header
LB: loop body
LE: loop exit
PB: predicated region body
PF: predicated region fallthrough
CT: control target
= control target key end

     0   :  { %10 = vsyncpa [#allocation3], 0  ;;  %s976_s0 = inlined_call_operand.hbm [shape: bf16[16,768], index: 0, kind: input, shape index: {}]   ;;  %s977_s1 = inlined_call_operand.hbm [shape: bf16[768,128], index: 1, kind: input, shape index: {}]   ;;  %s978_s2 = inlined_call_operand.vmem [shape: f32[1,128], index: 2, kind: input, shape index: {}]   ;;  %s979_s3 = inlined_call_operand.hbm [shape: f32[16,128], index: 3, kind: input, shape index: {}]   ;;  %s980_s4 = inlined_call_operand.vmem [shape: f32[1,128], index: 4, kind: input, shape index: {}]   ;;  %s981_s5 = inlined_call_operand.vmem [shape: f32[16,1], index: 5, kind: output, shape index: {}]  }
   0x1   :  { %11 = vsyncpa [#allocation5], 0  ;;  %s916_s18 = smov [#allocation4]  }
   0x2   :  { %s29_s19 = sshll.u32 %s916_s18, 4  ;;  %s30_s19 = int_to_ptr.vmem [resolvable:$true] %s29_s19 }
   0x3   :  { %s860_s20 = scalar_lea.vmem %s30_s19, 6144  ;;  %p865_p1 = scmp.lt.s32.totalorder %s30_s19, %s30_s19 }
   0x4   :  { %p861_p0 = scmp.ne.s32.totalorder %s30_s19, %s860_s20  ;;  %p866_p2 = scmp.lt.s32.totalorder %s860_s20, %s860_s20 }
   0x6   :  { %p867_p3 = por %p866_p2, %p865_p1 }
   0x8   :  { %p868_p4 = pnand %p867_p3, %p861_p0 }
   0xa   :  { %871 = shalt.err (!%p868_p4)
}
   0xb   :  { %s917_s21 = smov 64   ;;  %s918_s22 = smov 4  }
   0xc   :  { %35 = dma.hbm_to_vmem [thread:$0]  %s977_s1, 6144, %s30_s19, [#allocation5], %s917_s21, %s917_s21, %s918_s22  }
   0xd   :  { %s919_s25 = smov [#allocation2]  }
   0xe   :  { %s17_s26 = sshll.u32 %s919_s25, 4  ;;  %s18_s26 = int_to_ptr.vmem [resolvable:$true] %s17_s26 }
   0xf   :  { %s880_s27 = scalar_lea.vmem %s18_s26, 768  ;;  %p885_p6 = scmp.lt.s32.totalorder %s18_s26, %s18_s26 }
  0x10   :  { %p881_p5 = scmp.ne.s32.totalorder %s18_s26, %s880_s27  ;;  %p886_p7 = scmp.lt.s32.totalorder %s880_s27, %s880_s27 }
  0x12   :  { %p887_p8 = por %p886_p7, %p885_p6 }
  0x14   :  { %p888_p9 = pnand %p887_p8, %p881_p5 }
  0x16   :  { %891 = shalt.err (!%p888_p9)
}
  0x17   :  { %s920_s28 = smov 384   ;;  %s921_s29 = smov 24  }
  0x18   :  { %23 = dma.hbm_to_vmem [thread:$0]  %s976_s0, 768, %s18_s26, [#allocation3], %s920_s28, %s920_s28, %s921_s29  }
  0x19   :  { %s922_s7 = smov [#allocation6]  }
  0x1a   :  { %s43_s8 = sshll.u32 %s922_s7, 4  ;;  %s44_s8 = int_to_ptr.vmem [resolvable:$true] %s43_s8 }
  0x1b   :  { %s900_s1 = scalar_lea.vmem %s44_s8, 256  ;;  %p905_p11 = scmp.lt.s32.totalorder %s44_s8, %s44_s8 }
  0x1c   :  { %p901_p10 = scmp.ne.s32.totalorder %s44_s8, %s900_s1  ;;  %p906_p12 = scmp.lt.s32.totalorder %s900_s1, %s900_s1 }
  0x1e   :  { %p907_p13 = por %p906_p12, %p905_p11 }
  0x20   :  { %p908_p0 = pnand %p907_p13, %p901_p10 }
  0x22   :  { %911 = shalt.err (!%p908_p0)
}
  0x23   :  { %s923_s9 = smov 128   ;;  %s924_s10 = smov 8  }
  0x24   :  { %49 = dma.hbm_to_vmem [thread:$0]  %s979_s3, 256, %s44_s8, [#allocation5], %s923_s9, %s923_s9, %s924_s10  }
  0x25   :  { %912 = dma.done.wait [#allocation3], 768  }
  0x26   :  { %913 = vsyncadd [#allocation3], 4294966528 }
  0x27   :  { %914 = dma.done.wait [#allocation5], 6400  }
  0x28   :  { %915 = vsyncadd [#allocation5], 4294960896  ;;  %v787_v0 = vld [vmem:[#allocation4 + $0x78] sm:$0xff]   ;;  %v791_v4 = vld [vmem:[#allocation4 + $0x70] sm:$0xff]   ;;  %vm647_vm0 = vcmask 7168  }
  0x29   :  { %v788_v1 = vld [vmem:[#allocation4 + $0xf8] sm:$0xff]   ;;  %712 = vmatprep.subr.bf16.mxu0 %v787_v0  ;;  %v792_v5 = vld [vmem:[#allocation4 + $0xf0] sm:$0xff]   ;;  %v795_v8 = vld [vmem:[#allocation4 + $0x68] sm:$0xff]  }
  0x2a   :  { %v789_v2 = vld [vmem:[#allocation4 + $0x38] sm:$0xff]   ;;  %734 = vmatprep.subr.bf16.mxu1 %v788_v1  ;;  %v793_v6 = vld [vmem:[#allocation4 + $0x30] sm:$0xff]   ;;  %v796_v9 = vld [vmem:[#allocation4 + $0xe8] sm:$0xff]  }
  0x2b   :  { %v790_v3 = vld [vmem:[#allocation4 + $0xb8] sm:$0xff]   ;;  %713 = vmatpush3.bf16.msra.mxu0 %v789_v2  ;;  %v794_v7 = vld [vmem:[#allocation4 + $0xb0] sm:$0xff]   ;;  %v797_v10 = vld [vmem:[#allocation4 + $0x28] sm:$0xff]  }
  0x2c   :  { %735 = vmatpush3.bf16.msra.mxu1 %v790_v3  ;;  %714 = vmatprep.subr.bf16.mxu0 %v791_v4  ;;  %v798_v11 = vld [vmem:[#allocation4 + $0xa8] sm:$0xff]   ;;  %v799_v12 = vld [vmem:[#allocation4 + $0x60] sm:$0xff]   ;;  %v803_v16 = vld [vmem:[#allocation4 + $0x58] sm:$0xff]  }
  0x2d   :  { %736 = vmatprep.subr.bf16.mxu1 %v792_v5  ;;  %v800_v13 = vld [vmem:[#allocation4 + $0xe0] sm:$0xff]   ;;  %v804_v17 = vld [vmem:[#allocation4 + $0xd8] sm:$0xff]   ;;  %v807_v20 = vld [vmem:[#allocation4 + $0x50] sm:$0xff]  }
  0x2e   :  { %v801_v14 = vld [vmem:[#allocation4 + $0x20] sm:$0xff]   ;;  %v805_v18 = vld [vmem:[#allocation4 + $0x18] sm:$0xff]   ;;  %v808_v21 = vld [vmem:[#allocation4 + $0xd0] sm:$0xff]  }
  0x2f   :  { %715 = vmatpush3.bf16.msra.mxu0 %v793_v6  ;;  %v802_v15 = vld [vmem:[#allocation4 + $0xa0] sm:$0xff]   ;;  %v806_v19 = vld [vmem:[#allocation4 + $0x98] sm:$0xff]   ;;  %v809_v22 = vld [vmem:[#allocation4 + $0x10] sm:$0xff]  }
  0x30   :  { %737 = vmatpush3.bf16.msra.mxu1 %v794_v7  ;;  %716 = vmatprep.subr.bf16.mxu0 %v795_v8  ;;  %v810_v23 = vld [vmem:[#allocation4 + $0x90] sm:$0xff]   ;;  %v811_v24 = vld [vmem:[#allocation4 + $0x48] sm:$0xff]   ;;  %v815_v28 = vld [vmem:[#allocation4 + $0x40] sm:$0xff]  }
  0x31   :  { %738 = vmatprep.subr.bf16.mxu1 %v796_v9  ;;  %v812_v25 = vld [vmem:[#allocation4 + $0xc8] sm:$0xff]   ;;  %v816_v29 = vld [vmem:[#allocation4 + $0xc0] sm:$0xff]   ;;  %v822_v34 = vld [vmem:[#allocation2 + $0x8] ss:$24 sps:$4 sm:$0xff]  }
  0x32   :  { %v813_v26 = vld [vmem:[#allocation4 + $0x8] sm:$0xff]   ;;  %v817_v30 = vld [vmem:[#allocation4] sm:$0xff]   ;;  %v824_v35 = vld [vmem:[#allocation2 + $0xc] ss:$24 sps:$4 sm:$0xff]  }
  0x33   :  { %717 = vmatpush3.bf16.msra.mxu0 %v797_v10  ;;  %v814_v27 = vld [vmem:[#allocation4 + $0x88] sm:$0xff]   ;;  %v818_v31 = vld [vmem:[#allocation4 + $0x80] sm:$0xff]   ;;  %v825_v36 = vld [vmem:[#allocation4 + $0x178] sm:$0xff]   ;;  %555 = vmatprep.mubr.bf16.mxu1 %v824_v35 }
  0x34   :  { %739 = vmatpush3.bf16.msra.mxu1 %v798_v11  ;;  %718 = vmatprep.subr.bf16.mxu0 %v799_v12  ;;  %v819_v32 = vld [vmem:[#allocation2] ss:$24 sps:$4 sm:$0xff]   ;;  %v821_v33 = vld [vmem:[#allocation2 + $0x4] ss:$24 sps:$4 sm:$0xff]   ;;  %v826_v37 = vld [vmem:[#allocation4 + $0x138] sm:$0xff]  }
  0x35   :  { %740 = vmatprep.subr.bf16.mxu1 %v800_v13  ;;  %514 = vmatprep.mubr.bf16.mxu0 %v821_v33  ;;  %v827_v38 = vld [vmem:[#allocation4 + $0x170] sm:$0xff]   ;;  %v829_v40 = vld [vmem:[#allocation4 + $0x168] sm:$0xff]   ;;  %v831_v42 = vld [vmem:[#allocation4 + $0x160] sm:$0xff]  }
  0x36   :  { %v828_v39 = vld [vmem:[#allocation4 + $0x130] sm:$0xff]   ;;  %v830_v41 = vld [vmem:[#allocation4 + $0x128] sm:$0xff]   ;;  %v832_v43 = vld [vmem:[#allocation4 + $0x120] sm:$0xff]  }
  0x37   :  { %719 = vmatpush3.bf16.msra.mxu0 %v801_v14  ;;  %v833_v44 = vld [vmem:[#allocation4 + $0x158] sm:$0xff]   ;;  %v835_v46 = vld [vmem:[#allocation4 + $0x150] sm:$0xff]   ;;  %v837_v49 = vld [vmem:[#allocation4 + $0x148] sm:$0xff]  }
  0x38   :  { %741 = vmatpush3.bf16.msra.mxu1 %v802_v15  ;;  %720 = vmatprep.subr.bf16.mxu0 %v803_v16  ;;  %v834_v45 = vld [vmem:[#allocation4 + $0x118] sm:$0xff]   ;;  %v836_v48 = vld [vmem:[#allocation4 + $0x110] sm:$0xff]   ;;  %v838_v50 = vld [vmem:[#allocation4 + $0x108] sm:$0xff]  }
  0x39   :  { %742 = vmatprep.subr.bf16.mxu1 %v804_v17  ;;  %v843_v47 = vld [vmem:[#allocation2 + $0x14] ss:$24 sps:$4 sm:$0xff]   ;;  %v841_v53 = vld [vmem:[#allocation2 + $0x10] ss:$24 sps:$4 sm:$0xff]   ;;  %v711_v55 = vld [vmem:[%s980_s4] ss:$0 sm:$0xff] }
  0x3a   :  { %v839_v51 = vld [vmem:[#allocation4 + $0x140] sm:$0xff]   ;;  %v619_v57 = vld [vmem:[#allocation6 + $0x8] sm:$0xff]  ;;  %v710_v12 = vld [vmem:[%s978_s2] ss:$0 sm:$0xff] }
  0x3b   :  { %721 = vmatpush3.bf16.msra.mxu0 %v805_v18  ;;  %v840_v52 = vld [vmem:[#allocation4 + $0x100] sm:$0xff]   ;;  %v628_v58 = vmul.f32 %v711_v55, %v619_v57 }
  0x3c   :  { %743 = vmatpush3.bf16.msra.mxu1 %v806_v19  ;;  %722 = vmatprep.subr.bf16.mxu0 %v807_v20  ;;  %v618_v54 = vld [vmem:[#allocation6] sm:$0xff] }
  0x3d   :  { %744 = vmatprep.subr.bf16.mxu1 %v808_v21  ;;  %v627_v56 = vmul.f32 %v711_v55, %v618_v54 }
  0x3f   :  { %723 = vmatpush3.bf16.msra.mxu0 %v809_v22  ;;  %629 = vadd.xlane.f32.xlu1 %v627_v56 }
  0x40   :  { %745 = vmatpush3.bf16.msra.mxu1 %v810_v23  ;;  %724 = vmatprep.subr.bf16.mxu0 %v811_v24 }
  0x41   :  { %746 = vmatprep.subr.bf16.mxu1 %v812_v25 }
  0x43   :  { %725 = vmatpush3.bf16.msra.mxu0 %v813_v26  ;;  %631 = vadd.xlane.f32.xlu1 %v628_v58 }
  0x44   :  { %747 = vmatpush3.bf16.msra.mxu1 %v814_v27  ;;  %726 = vmatprep.subr.bf16.mxu0 %v815_v28 }
  0x45   :  { %748 = vmatprep.subr.bf16.mxu1 %v816_v29 }
  0x47   :  { %727 = vmatpush3.bf16.msra.mxu0 %v817_v30 }
  0x48   :  { %749 = vmatpush3.bf16.msra.mxu1 %v818_v31  ;;  %756 = vmatprep.subr.bf16.mxu0 %v825_v36 }
  0x4a   :  { %515 = vmatmul.mubr.bf16.vlgmr.msra.gmra.mxu0 %v819_v32 }
  0x4b   :  { %556 = vmatmul.mubr.bf16.vlgmr.msra.gmra.mxu1 %v822_v34  ;;  %757 = vmatpush3.bf16.msra.mxu0 %v826_v37 }
  0x4c   :  { %758 = vmatprep.subr.bf16.mxu0 %v827_v38  ;;  %596 = vmatprep.mubr.bf16.mxu0 %v843_v47 }
  0x4f   :  { %759 = vmatpush3.bf16.msra.mxu0 %v828_v39 }
  0x50   :  { %760 = vmatprep.subr.bf16.mxu0 %v829_v40 }
  0x53   :  { %761 = vmatpush3.bf16.msra.mxu0 %v830_v41 }
  0x54   :  { %762 = vmatprep.subr.bf16.mxu0 %v831_v42 }
  0x57   :  { %763 = vmatpush3.bf16.msra.mxu0 %v832_v43 }
  0x58   :  { %764 = vmatprep.subr.bf16.mxu0 %v833_v44 }
  0x5b   :  { %765 = vmatpush3.bf16.msra.mxu0 %v834_v45 }
  0x5c   :  { %766 = vmatprep.subr.bf16.mxu0 %v835_v46 }
  0x5f   :  { %767 = vmatpush3.bf16.msra.mxu0 %v836_v48 }
  0x60   :  { %768 = vmatprep.subr.bf16.mxu0 %v837_v49 }
  0x63   :  { %769 = vmatpush3.bf16.msra.mxu0 %v838_v50 }
  0x64   :  { %770 = vmatprep.subr.bf16.mxu0 %v839_v51 }
  0x67   :  { %771 = vmatpush3.bf16.msra.mxu0 %v840_v52 }
  0x6a   :  { %597 = vmatmul.mubr.bf16.vlgmr.msra.gmra.mxu0 %v841_v53 }
  0xc8   :  { %v630_v20 = vpop.xlane.xlu1 %629 }
  0xcc   :  { %v632_v23 = vpop.xlane.xlu1 %631 }
 0x10a   :  { %v728_v59 = vpop.f32.mrf.mxu0 }
 0x10b   :  { %v750_v60 = vpop.f32.mrf.mxu1 }
 0x10c   :  { %v729_v61 = vpop.f32.mrf.mxu0 }
 0x10d   :  { %v751_v62 = vpop.f32.mrf.mxu1  ;;  %v730_v2 = vadd.f32 %v729_v61, %v728_v59 }
 0x10e   :  { %v731_v63 = vpop.f32.mrf.mxu0  ;;  %v752_v3 = vadd.f32 %v751_v62, %v750_v60 }
 0x10f   :  { %v753_v0 = vpop.f32.mrf.mxu1 }
 0x110   :  { %v732_v1 = vpop.f32.mrf.mxu0  ;;  %v558_v7 = vadd.f32 %v752_v3, %v730_v2 }
 0x111   :  { %v754_v4 = vpop.f32.mrf.mxu1  ;;  %v733_v8 = vadd.f32 %v732_v1, %v731_v63 }
 0x112   :  { %v755_v9 = vadd.f32 %v754_v4, %v753_v0 }
 0x114   :  { %v561_v15 = vadd.f32 %v755_v9, %v733_v8 }
 0x12a   :  { %v772_v5 = vpop.f32.mrf.mxu0 }
 0x12c   :  { %v773_v6 = vpop.f32.mrf.mxu0 }
 0x12d   :  { %v774_v10 = vadd.f32 %v773_v6, %v772_v5 }
 0x12e   :  { %v775_v11 = vpop.f32.mrf.mxu0 }
 0x12f   :  { %v599_v13 = vadd.f32 %v774_v10, %v558_v7 }
 0x130   :  { %v776_v14 = vpop.f32.mrf.mxu0 }
 0x131   :  { %v777_v16 = vadd.f32 %v776_v14, %v775_v11  ;;  %v612_v17 = vmul.f32 %v710_v12, %v599_v13 }
 0x133   :  { %v602_v18 = vadd.f32 %v777_v16, %v561_v15  ;;  %614 = vadd.xlane.f32.xlu0 %v612_v17 }
 0x135   :  { %v613_v19 = vmul.f32 %v710_v12, %v602_v18 }
 0x137   :  { %616 = vadd.xlane.f32.xlu0 %v613_v19 }
 0x1bc   :  { %v615_v21 = vpop.xlane.xlu0 %614 }
 0x1bd   :  { %v633_v22 = vadd.f32 %v630_v20, %v615_v21 }
 0x1bf   :  { %v635_v24 = vsub.f32 0.0, %v633_v22 }
 0x1c0   :  { %v617_v25 = vpop.xlane.xlu0 %616 }
 0x1c1   :  { %v637_v26 = vmul.f32 1.442695, %v635_v24  ;;  %v634_v27 = vadd.f32 %v632_v23, %v617_v25 }
 0x1c3   :  { %844 = vpow2.f32 %v637_v26  ;;  %v636_v28 = vsub.f32 0.0, %v634_v27 }
 0x1c5   :  { %v639_v29 = vmul.f32 1.442695, %v636_v28 }
 0x1c7   :  { %846 = vpow2.f32 %v639_v29 }
 0x1d0   :  { %v845_v30 = vpop.eup %844 }
 0x1d1   :  { %v641_v31 = vadd.f32 1.0, %v845_v30 }
 0x1d3   :  { %848 = vrcp.f32 %v641_v31 }
 0x1d4   :  { %v847_v32 = vpop.eup %846 }
 0x1d5   :  { %v642_v33 = vadd.f32 1.0, %v847_v32 }
 0x1d7   :  { %850 = vrcp.f32 %v642_v33 }
 0x1e0   :  { %v849_v34 = vpop.eup %848 }
 0x1e1   :  { %648 = vst.msk [vmem:[%s981_s5] sm:$0xff] %vm647_vm0, %v849_v34 }
 0x1e4   :  { %v851_v35 = vpop.eup %850 }
 0x1e5   :  { %649 = vst.msk [vmem:[%s981_s5 + $0x8] sm:$0xff] %vm647_vm0, %v851_v35 }
 0x1e6   :  { %654 = vsyncpa [#allocation3], 1 }
 0x1e7   :  { %655 = vsyncpa [#allocation5], 1 }

</bundles_post_ra>
